<compile_context>
chip_gen: v7x
topology: tpu7x:2x2x1
jax: 0.10.0
libtpu: 0.0.40
codegen_flags: <defaults>
</compile_context>

<pallas_src>
import functools

import jax
import jax.numpy as jnp
from jax.experimental import pallas as pl
from jax.experimental.pallas import tpu as pltpu

LANE = 128                      # lane width: feature dims padded to this
TM = 256                        # row tile (and node-dim padding granularity)
VMEM_LIMIT_BYTES = 48 * 1024 * 1024


def _round_up(n, m):
    return ((n + m - 1) // m) * m


def _pad2d(x, rows, cols):
    r, c = x.shape
    return jnp.pad(x, ((0, rows - r), (0, cols - c)))


# --------------------------------------------------------------------------- #
# Kernels
# --------------------------------------------------------------------------- #
def _project_kernel(x_ref, w_ref, b_ref, zl_ref, zr_ref, *, split):
    """z = x @ [Wl | Wr] + [0 | b];  split into (zl: bf16, zr: f32)."""
    z = jnp.dot(x_ref[...], w_ref[...],
                preferred_element_type=jnp.float32) + b_ref[...]
    zl_ref[...] = z[:, :split].astype(zl_ref.dtype)
    zr_ref[...] = z[:, split:]


def _agg_relu_project_kernel(a_ref, zl_ref, zr_ref, w_ref, b_ref,
                             z2l_ref, z2r_ref, *, split):
    """Layer-1 aggregation + relu, fused with the layer-2 projection."""
    agg = jnp.dot(a_ref[...], zl_ref[...], preferred_element_type=jnp.float32)
    h = jnp.maximum(agg + zr_ref[...], 0.0)
    # dropout(p=0.5) is identity in eval mode; h never leaves vregs/VMEM here.
    z2 = jnp.dot(h.astype(jnp.bfloat16), w_ref[...],
                 preferred_element_type=jnp.float32) + b_ref[...]
    z2l_ref[...] = z2[:, :split].astype(z2l_ref.dtype)
    z2r_ref[...] = z2[:, split:]


def _agg_logsoftmax_kernel(a_ref, zl_ref, zr_ref, o_ref):
    """Layer-2 aggregation + log_softmax (padded class lanes already -1e30)."""
    logits = jnp.dot(a_ref[...], zl_ref[...],
                     preferred_element_type=jnp.float32) + zr_ref[...]
    m = jnp.max(logits, axis=-1, keepdims=True)
    s = logits - m
    lse = jnp.log(jnp.sum(jnp.exp(s), axis=-1, keepdims=True))
    o_ref[...] = (s - lse).astype(o_ref.dtype)


# --------------------------------------------------------------------------- #
# pallas_call wrappers
# --------------------------------------------------------------------------- #
def _compiler_params():
    return pltpu.CompilerParams(
        dimension_semantics=("parallel",),          # row tiles independent; v7x megacore
        vmem_limit_bytes=VMEM_LIMIT_BYTES)


def _project(x_bf16, w_cat, b_cat, h_p):
    n_p, f_p = x_bf16.shape
    kernel = functools.partial(_project_kernel, split=h_p)
    return pl.pallas_call(
        kernel,
        out_shape=[jax.ShapeDtypeStruct((n_p, h_p), jnp.bfloat16),
                   jax.ShapeDtypeStruct((n_p, h_p), jnp.float32)],
        grid_spec=pltpu.PrefetchScalarGridSpec(
            num_scalar_prefetch=0,
            grid=(n_p // TM,),
            in_specs=[
                pl.BlockSpec((TM, f_p), lambda i: (i, 0)),        # x row tile
                pl.BlockSpec(w_cat.shape, lambda i: (0, 0)),      # [Wl|Wr] resident
                pl.BlockSpec(b_cat.shape, lambda i: (0, 0)),      # bias resident
            ],
            out_specs=[pl.BlockSpec((TM, h_p), lambda i: (i, 0)),
                       pl.BlockSpec((TM, h_p), lambda i: (i, 0))],
        ),
        compiler_params=_compiler_params(),
    )(x_bf16, w_cat, b_cat)


def _agg_relu_project(a, z1l, z1r, w_cat2, b_cat2, o_p):
    n_p = a.shape[0]
    h_p = z1l.shape[1]
    kernel = functools.partial(_agg_relu_project_kernel, split=o_p)
    return pl.pallas_call(
        kernel,
        out_shape=[jax.ShapeDtypeStruct((n_p, o_p), jnp.bfloat16),
                   jax.ShapeDtypeStruct((n_p, o_p), jnp.float32)],
        grid_spec=pltpu.PrefetchScalarGridSpec(
            num_scalar_prefetch=0,
            grid=(n_p // TM,),
            in_specs=[
                pl.BlockSpec((TM, n_p), lambda i: (i, 0)),        # A row tile (streamed)
                pl.BlockSpec((n_p, h_p), lambda i: (0, 0)),       # z1_l resident (bf16)
                pl.BlockSpec((TM, h_p), lambda i: (i, 0)),        # z1_r row tile (f32)
                pl.BlockSpec(w_cat2.shape, lambda i: (0, 0)),     # [Wl2|Wr2] resident
                pl.BlockSpec(b_cat2.shape, lambda i: (0, 0)),     # bias+mask resident
            ],
            out_specs=[pl.BlockSpec((TM, o_p), lambda i: (i, 0)),
                       pl.BlockSpec((TM, o_p), lambda i: (i, 0))],
        ),
        compiler_params=_compiler_params(),
    )(a, z1l, z1r, w_cat2, b_cat2)


def _agg_logsoftmax(a, z2l, z2r):
    n_p = a.shape[0]
    o_p = z2l.shape[1]
    return pl.pallas_call(
        _agg_logsoftmax_kernel,
        out_shape=jax.ShapeDtypeStruct((n_p, o_p), jnp.float32),
        grid_spec=pltpu.PrefetchScalarGridSpec(
            num_scalar_prefetch=0,
            grid=(n_p // TM,),
            in_specs=[
                pl.BlockSpec((TM, n_p), lambda i: (i, 0)),        # A row tile (streamed)
                pl.BlockSpec((n_p, o_p), lambda i: (0, 0)),       # z2_l resident (bf16)
                pl.BlockSpec((TM, o_p), lambda i: (i, 0)),        # z2_r row tile (f32)
            ],
            out_specs=pl.BlockSpec((TM, o_p), lambda i: (i, 0)),
        ),
        compiler_params=_compiler_params(),
    )(a, z2l, z2r)


# --------------------------------------------------------------------------- #
# Graph preprocessing (XLA glue)
# --------------------------------------------------------------------------- #
def build_mean_adjacency(edge_index, num_nodes, padded_nodes):
    """Dense row-normalized adjacency, O(E) scatters, cast to bf16.

    A[i, j] = count(j -> i) / deg_in(i); nodes with no in-edges aggregate to 0
    (matches PyG scatter-mean). edge_index row 0 = source, row 1 = target.
    Padded rows/cols (>= num_nodes) are zero.
    """
    src, dst = edge_index[0], edge_index[1]
    deg = jnp.zeros((num_nodes,), jnp.float32).at[dst].add(1.0)
    inv_deg = 1.0 / jnp.maximum(deg, 1.0)
    adj = jnp.zeros((padded_nodes, padded_nodes), jnp.float32)
    adj = adj.at[dst, src].add(inv_deg[dst])
    return adj.astype(jnp.bfloat16)


# --------------------------------------------------------------------------- #
# Model
# --------------------------------------------------------------------------- #
class GraphSAGEPallas:
    """GraphSAGE forward (eval mode) as a three-stage Pallas TPU pipeline."""

    def __init__(self, dim_in, dim_h, dim_out, key):
        ks = jax.random.split(key, 6)

        def glorot(k, fan_in, fan_out):
            lim = (6.0 / (fan_in + fan_out)) ** 0.5
            # stored transposed: (fan_in, fan_out)
            return jax.random.uniform(k, (fan_in, fan_out), jnp.float32, -lim, lim)

        self.dim_in, self.dim_h, self.dim_out = dim_in, dim_h, dim_out

        # unpadded f32 parameters (also used by the pure-JAX reference)
        self.wl1 = glorot(ks[0], dim_in, dim_h)      # lin_l weight^T
        self.wr1 = glorot(ks[1], dim_in, dim_h)      # lin_r weight^T
        self.b1 = 0.1 * jax.random.normal(ks[2], (dim_h,), jnp.float32)
        self.wl2 = glorot(ks[3], dim_h, dim_out)
        self.wr2 = glorot(ks[4], dim_h, dim_out)
        self.b2 = 0.1 * jax.random.normal(ks[5], (dim_out,), jnp.float32)

        di_p = _round_up(dim_in, LANE)
        dh_p = _round_up(dim_h, LANE)
        do_p = _round_up(dim_out, LANE)
        self._di_p, self._dh_p, self._do_p = di_p, dh_p, do_p

        # Layer 1: concatenated [Wl1 | Wr1] (bf16) and [0 | b1] (f32).
        wcat1 = jnp.zeros((di_p, 2 * dh_p), jnp.float32)
        wcat1 = wcat1.at[:dim_in, :dim_h].set(self.wl1)
        wcat1 = wcat1.at[:dim_in, dh_p:dh_p + dim_h].set(self.wr1)
        self._wcat1 = wcat1.astype(jnp.bfloat16)
        bcat1 = jnp.zeros((1, 2 * dh_p), jnp.float32)
        self._bcat1 = bcat1.at[0, dh_p:dh_p + dim_h].set(self.b1)

        # Layer 2: concatenated [Wl2 | Wr2] (bf16) and [0 | b2] with the
        # class-padding mask (-1e30) baked into the padded bias lanes so no
        # iota/where is needed before log_softmax.
        wcat2 = jnp.zeros((dh_p, 2 * do_p), jnp.float32)
        wcat2 = wcat2.at[:dim_h, :dim_out].set(self.wl2)
        wcat2 = wcat2.at[:dim_h, do_p:do_p + dim_out].set(self.wr2)
        self._wcat2 = wcat2.astype(jnp.bfloat16)
        bcat2 = jnp.zeros((1, 2 * do_p), jnp.float32)
        bcat2 = bcat2.at[0, do_p:do_p + dim_out].set(self.b2)
        bcat2 = bcat2.at[0, do_p + dim_out:].set(-1e30)
        self._bcat2 = bcat2

    def __call__(self, x, edge_index):
        n = x.shape[0]
        n_p = _round_up(n, TM)                       # lane-dense node padding
        a_p = build_mean_adjacency(edge_index, n, n_p)           # (n_p, n_p) bf16
        x_p = _pad2d(x, n_p, self._di_p).astype(jnp.bfloat16)    # (n_p, Fin_p)

        z1l, z1r = _project(x_p, self._wcat1, self._bcat1, self._dh_p)
        z2l, z2r = _agg_relu_project(a_p, z1l, z1r,
                                     self._wcat2, self._bcat2, self._do_p)
        out_p = _agg_logsoftmax(a_p, z2l, z2r)
        return out_p[:n, :self.dim_out]


# --------------------------------------------------------------------------- #
# Pure-JAX f32 reference (original association order) for correctness checks
# --------------------------------------------------------------------------- #
def _reference_forward(model, x, edge_index):
    n = x.shape[0]
    src, dst = edge_index[0], edge_index[1]
    adj = jnp.zeros((n, n), jnp.float32).at[dst, src].add(1.0)
    a = adj / jnp.maximum(adj.sum(axis=1, keepdims=True), 1.0)
    h = jnp.maximum((a @ x) @ model.wl1 + x @ model.wr1 + model.b1, 0.0)
    h = (a @ h) @ model.wl2 + h @ model.wr2 + model.b2
    return jax.nn.log_softmax(h, axis=1)


if __name__ == "__main__":
    key = jax.random.PRNGKey(0)

    def run_case(case_key, num_nodes, num_edges, dim_in, dim_h, dim_out):
        k_x, k_e, k_w = jax.random.split(case_key, 3)
        x = jax.random.normal(k_x, (num_nodes, dim_in), jnp.float32)
        edge_index = jax.random.randint(k_e, (2, num_edges), 0, num_nodes,
                                        jnp.int32)
        model = GraphSAGEPallas(dim_in, dim_h, dim_out, k_w)
        out = jax.block_until_ready(model(x, edge_index))
        ref = _reference_forward(model, x, edge_index)
        assert out.shape == (num_nodes, dim_out)
        # bf16 MXU operands (A, X, projections) -> tolerance loosened vs f32 ref
        assert bool(jnp.allclose(out, ref, atol=1e-1, rtol=1e-1)), \
            "mismatch vs reference"

    k1, k2 = jax.random.split(key)
    # Small NeighborLoader-like batch: single row tile, heavy row padding.
    run_case(k1, num_nodes=8, num_edges=24, dim_in=32, dim_h=16, dim_out=8)
    # Pubmed-like dims, node count not a multiple of the tile: multi-tile grid
    # with genuine row/class padding exercised.
    run_case(k2, num_nodes=300, num_edges=1500, dim_in=500, dim_h=64, dim_out=3)

    print("KERNEL_OK")
</pallas_src>

<mosaic_0001>
module attributes {stable_mosaic.version = 11 : i64} {
  func.func @_project_kernel(%arg0: i32, %arg1: memref<256x128xbf16, #tpu.memory_space<vmem>>, %arg2: memref<128x256xbf16, #tpu.memory_space<vmem>>, %arg3: memref<1x256xf32, #tpu.memory_space<vmem>>, %arg4: memref<256x128xbf16, #tpu.memory_space<vmem>>, %arg5: memref<256x128xf32, #tpu.memory_space<vmem>>) attributes {dimension_semantics = [#tpu.dimension_semantics<parallel>], iteration_bounds = array<i64: 1>, scalar_prefetch = 0 : i64, scratch_operands = 0 : i64, tpu.core_type = #tpu.core_type<tc>, window_params = [{transform_indices = @transform_0, window_bounds = array<i64: 256, 128>}, {pipeline_mode = #tpu.pipeline_mode<synchronous>, transform_indices = @transform_1, window_bounds = array<i64: 128, 256>}, {pipeline_mode = #tpu.pipeline_mode<synchronous>, transform_indices = @transform_2, window_bounds = array<i64: 1, 256>}, {transform_indices = @transform_3, window_bounds = array<i64: 256, 128>}, {transform_indices = @transform_4, window_bounds = array<i64: 256, 128>}]} {
    %c0 = arith.constant 0 : index
    %c0_0 = arith.constant 0 : index
    %0 = vector.load %arg1[%c0, %c0_0] : memref<256x128xbf16, #tpu.memory_space<vmem>>, vector<256x128xbf16>
    %c0_1 = arith.constant 0 : index
    %c0_2 = arith.constant 0 : index
    %1 = vector.load %arg2[%c0_1, %c0_2] : memref<128x256xbf16, #tpu.memory_space<vmem>>, vector<128x256xbf16>
    %cst = arith.constant dense<0.000000e+00> : vector<256x256xf32>
    %2 = tpu.matmul %0, %1, %cst {dimension_numbers = #tpu.dot_dimension_numbers<[1], [0], [0], [1], [0, 0, 1, 1], [], []>} : vector<256x128xbf16>, vector<128x256xbf16>, vector<256x256xf32> -> vector<256x256xf32>
    %c0_3 = arith.constant 0 : index
    %c0_4 = arith.constant 0 : index
    %3 = vector.load %arg3[%c0_3, %c0_4] : memref<1x256xf32, #tpu.memory_space<vmem>>, vector<1x256xf32>
    %4 = vector.broadcast %3 : vector<1x256xf32> to vector<256x256xf32>
    %5 = arith.addf %2, %4 : vector<256x256xf32>
    %6 = vector.extract_strided_slice %5 {offsets = [0, 0], sizes = [256, 128], strides = [1, 1]} : vector<256x256xf32> to vector<256x128xf32>
    %7 = arith.truncf %6 : vector<256x128xf32> to vector<256x128xbf16>
    %c0_5 = arith.constant 0 : index
    %c0_6 = arith.constant 0 : index
    %8 = vector.load %arg4[%c0_5, %c0_6] : memref<256x128xbf16, #tpu.memory_space<vmem>>, vector<256x128xbf16>
    tpu.vector_store %arg4[%c0_5, %c0_6], %7 {strides = array<i32>} : memref<256x128xbf16, #tpu.memory_space<vmem>>, vector<256x128xbf16>,
    %9 = vector.extract_strided_slice %5 {offsets = [0, 128], sizes = [256, 128], strides = [1, 1]} : vector<256x256xf32> to vector<256x128xf32>
    %c0_7 = arith.constant 0 : index
    %c0_8 = arith.constant 0 : index
    %10 = vector.load %arg5[%c0_7, %c0_8] : memref<256x128xf32, #tpu.memory_space<vmem>>, vector<256x128xf32>
    tpu.vector_store %arg5[%c0_7, %c0_8], %9 {strides = array<i32>} : memref<256x128xf32, #tpu.memory_space<vmem>>, vector<256x128xf32>,
    return
  }
  func.func @transform_0(%arg0: i32) -> (i32, i32) {
    %c0_i32 = arith.constant 0 : i32
    %c0_i32_0 = arith.constant 0 : i32
    return %arg0, %c0_i32 : i32, i32
  }
  func.func @transform_1(%arg0: i32) -> (i32, i32) {
    %c0_i32 = arith.constant 0 : i32
    %c0_i32_0 = arith.constant 0 : i32
    %c0_i32_1 = arith.constant 0 : i32
    return %c0_i32, %c0_i32_0 : i32, i32
  }
  func.func @transform_2(%arg0: i32) -> (i32, i32) {
    %c0_i32 = arith.constant 0 : i32
    %c0_i32_0 = arith.constant 0 : i32
    %c0_i32_1 = arith.constant 0 : i32
    return %c0_i32, %c0_i32_0 : i32, i32
  }
  func.func @transform_3(%arg0: i32) -> (i32, i32) {
    %c0_i32 = arith.constant 0 : i32
    %c0_i32_0 = arith.constant 0 : i32
    return %arg0, %c0_i32 : i32, i32
  }
  func.func @transform_4(%arg0: i32) -> (i32, i32) {
    %c0_i32 = arith.constant 0 : i32
    %c0_i32_0 = arith.constant 0 : i32
    return %arg0, %c0_i32 : i32, i32
  }
}

</mosaic_0001>

<bundles_post_ra>
// kernel: tpu_custom_call.1
= control target key start
LH: loop header
LB: loop body
LE: loop exit
PB: predicated region body
PF: predicated region fallthrough
CT: control target
= control target key end

     0   :  { %10 = vsyncpa [#allocation3], 0  ;;  %s1242_s0 = inlined_call_operand.hbm [shape: bf16[256,128], index: 0, kind: input, shape index: {}]   ;;  %s1243_s1 = inlined_call_operand.hbm [shape: bf16[128,256], index: 1, kind: input, shape index: {}]   ;;  %s1244_s2 = inlined_call_operand.vmem [shape: f32[1,256], index: 2, kind: input, shape index: {}]   ;;  %s1245_s3 = inlined_call_operand.hbm [shape: bf16[256,128], index: 3, kind: output, shape index: {0}]   ;;  %s1246_s4 = inlined_call_operand.hbm [shape: f32[256,128], index: 4, kind: output, shape index: {1}]  }
   0x1   :  { %11 = vsyncpa [#allocation6], 0 }
   0x2   :  { %12 = vsyncpa [#allocation4], 0 }
   0x3   :  { %13 = vsyncpa [#allocation9], 0  ;;  %s1054_s15 = smov [#allocation2]   ;;  %s958_s19 = scalar_lea.hbm %s1242_s0, 2048 }
   0x4   :  { %s19_s16 = sshll.u32 %s1054_s15, 4  ;;  %p959_p0 = scmp.ne.s32.totalorder %s1242_s0, %s958_s19  ;;  %s20_s16 = int_to_ptr.vmem [resolvable:$true] %s19_s16 }
   0x5   :  { %p962_p1 = scmp.lt.u32.totalorder %s958_s19, %s1242_s0 }
   0x7   :  { %p964_p2 = pnand %p962_p1, %p959_p0 }
   0x9   :  { %967 = shalt.err (!%p964_p2)
}
   0xa   :  { %s968_s24 = scalar_lea.vmem %s20_s16, 2048  ;;  %p973_p4 = scmp.lt.s32.totalorder %s20_s16, %s20_s16 }
   0xb   :  { %p969_p3 = scmp.ne.s32.totalorder %s20_s16, %s968_s24  ;;  %p974_p5 = scmp.lt.s32.totalorder %s968_s24, %s968_s24 }
   0xd   :  { %p975_p6 = por %p974_p5, %p973_p4 }
   0xf   :  { %p976_p7 = pnand %p975_p6, %p969_p3 }
  0x11   :  { %979 = shalt.err (!%p976_p7)
}
  0x12   :  { %s1055_s25 = smov 64   ;;  %s1056_s26 = smov 4  }
  0x13   :  { %25 = dma.hbm_to_vmem [thread:$0]  %s1242_s0, 2048, %s20_s16, [#allocation3], %s1055_s25, %s1055_s25, %s1056_s26  }
  0x14   :  { %s1057_s29 = smov [#allocation5]   ;;  %s980_s7 = scalar_lea.hbm %s1243_s1, 2048 }
  0x15   :  { %s31_s30 = sshll.u32 %s1057_s29, 4  ;;  %p981_p8 = scmp.ne.s32.totalorder %s1243_s1, %s980_s7  ;;  %s32_s30 = int_to_ptr.vmem [resolvable:$true] %s31_s30 }
  0x16   :  { %p984_p9 = scmp.lt.u32.totalorder %s980_s7, %s1243_s1 }
  0x18   :  { %p986_p10 = pnand %p984_p9, %p981_p8 }
  0x1a   :  { %989 = shalt.err (!%p986_p10)
}
  0x1b   :  { %s990_s12 = scalar_lea.vmem %s32_s30, 2048  ;;  %p995_p12 = scmp.lt.s32.totalorder %s32_s30, %s32_s30 }
  0x1c   :  { %p991_p11 = scmp.ne.s32.totalorder %s32_s30, %s990_s12  ;;  %p996_p13 = scmp.lt.s32.totalorder %s990_s12, %s990_s12 }
  0x1e   :  { %p997_p0 = por %p996_p13, %p995_p12 }
  0x20   :  { %p998_p1 = pnand %p997_p0, %p991_p11 }
  0x22   :  { %1001 = shalt.err (!%p998_p1)
}
  0x23   :  { %s1058_s0 = smov 128   ;;  %s1059_s13 = smov 8  }
  0x24   :  { %37 = dma.hbm_to_vmem [thread:$0]  %s1243_s1, 2048, %s32_s30, [#allocation6], %s1058_s0, %s1058_s0, %s1059_s13  }
  0x25   :  { %1046 = dma.done.wait [#allocation3], 2048  }
  0x26   :  { %1047 = vsyncadd [#allocation3], 4294965248 }
  0x27   :  { %1048 = dma.done.wait [#allocation6], 2048  }
  0x28   :  { %1049 = vsyncadd [#allocation6], 4294965248  ;;  %v1060_v0 = vmov 0   ;;  %v918_v1 = vld [vmem:[#allocation5 + $0x4] ss:$8 sps:$4 sm:$0xff]   ;;  %v946_v21 = vld [vmem:[#allocation2 + $0x10] sm:$0xff]   ;;  %v97_v33 = vlaneseq }
  0x29   :  { %315 = vmatprep.mubr.bf16.mxu0 %v1060_v0  ;;  %395 = vmatprep.mubr.bf16.mxu1 %v1060_v0  ;;  %v920_v2 = vld [vmem:[#allocation5] ss:$8 sps:$4 sm:$0xff]   ;;  %v921_v3 = vld [vmem:[#allocation5 + $0x14] ss:$8 sps:$4 sm:$0xff]   ;;  %v923_v4 = vld [vmem:[#allocation5 + $0x10] ss:$8 sps:$4 sm:$0xff]  }
  0x2a   :  { %283 = vmatprep.subr.bf16.mxu0 %v918_v1  ;;  %893 = vmatprep.subr.bf16.mxu1 %v918_v1  ;;  %v924_v5 = vld [vmem:[#allocation5 + $0x24] ss:$8 sps:$4 sm:$0xff]   ;;  %v926_v6 = vld [vmem:[#allocation5 + $0x20] ss:$8 sps:$4 sm:$0xff]   ;;  %v927_v7 = vld [vmem:[#allocation5 + $0x34] ss:$8 sps:$4 sm:$0xff]  }
  0x2b   :  { %284 = vmatpush1.bf16.msra.mxu0 %v920_v2  ;;  %901 = vmatpush1.bf16.msra.mxu1 %v920_v2  ;;  %v929_v8 = vld [vmem:[#allocation5 + $0x30] ss:$8 sps:$4 sm:$0xff]   ;;  %v930_v9 = vld [vmem:[#allocation5 + $0x44] ss:$8 sps:$4 sm:$0xff]   ;;  %v932_v10 = vld [vmem:[#allocation5 + $0x40] ss:$8 sps:$4 sm:$0xff]  }
  0x2c   :  { %285 = vmatprep.subr.bf16.mxu0 %v921_v3  ;;  %894 = vmatprep.subr.bf16.mxu1 %v921_v3  ;;  %v933_v11 = vld [vmem:[#allocation5 + $0x54] ss:$8 sps:$4 sm:$0xff]   ;;  %v935_v12 = vld [vmem:[#allocation5 + $0x50] ss:$8 sps:$4 sm:$0xff]   ;;  %v936_v13 = vld [vmem:[#allocation5 + $0x64] ss:$8 sps:$4 sm:$0xff]  }
  0x2d   :  { %v938_v14 = vld [vmem:[#allocation5 + $0x60] ss:$8 sps:$4 sm:$0xff]   ;;  %v939_v15 = vld [vmem:[#allocation5 + $0x74] ss:$8 sps:$4 sm:$0xff]   ;;  %v941_v16 = vld [vmem:[#allocation5 + $0x70] ss:$8 sps:$4 sm:$0xff]  }
  0x2e   :  { %v942_v17 = vld [vmem:[#allocation2] sm:$0xff]   ;;  %v944_v19 = vld [vmem:[#allocation2 + $0x8] sm:$0xff]   ;;  %v947_v22 = vld [vmem:[#allocation2 + $0x50] sm:$0xff]   ;;  %v98_v34 = vshrl.u32 %v97_v33, 7  ;;  %s1062_s18 = smov [#allocation7]  }
  0x2f   :  { %286 = vmatpush1.bf16.msra.mxu0 %v923_v4  ;;  %902 = vmatpush1.bf16.msra.mxu1 %v923_v4  ;;  %v943_v18 = vld [vmem:[#allocation2 + $0x40] sm:$0xff]   ;;  %v945_v20 = vld [vmem:[#allocation2 + $0x48] sm:$0xff]   ;;  %v948_v23 = vld [vmem:[#allocation2 + $0x18] sm:$0xff]   ;;  %s673_s19 = sshll.u32 %s1062_s18, 4  ;;  %s1205_s19 = int_to_ptr.vmem [resolvable:$true] %s673_s19 }
  0x30   :  { %287 = vmatprep.subr.bf16.mxu0 %v924_v5  ;;  %895 = vmatprep.subr.bf16.mxu1 %v924_v5  ;;  %v949_v24 = vld [vmem:[#allocation2 + $0x58] sm:$0xff]   ;;  %v950_v25 = vld [vmem:[#allocation2 + $0x20] sm:$0xff]   ;;  %v952_v27 = vld [vmem:[#allocation2 + $0x28] sm:$0xff]   ;;  %v103_v35 = vsub.s32 1, %v98_v34  ;;  %v99_v37 = vsub.s32 0, %v98_v34 }
  0x31   :  { %v951_v26 = vld [vmem:[#allocation2 + $0x60] sm:$0xff]   ;;  %v953_v28 = vld [vmem:[#allocation2 + $0x68] sm:$0xff]   ;;  %v954_v29 = vld [vmem:[#allocation2 + $0x30] sm:$0xff]  }
  0x32   :  { %v955_v30 = vld [vmem:[#allocation2 + $0x70] sm:$0xff]   ;;  %v956_v31 = vld [vmem:[#allocation2 + $0x38] sm:$0xff]   ;;  %v95_v36 = vld [vmem:[%s1244_s2] sm:$0x3]  ;;  %s1061_s2 = smov [#allocation8]  }
  0x33   :  { %288 = vmatpush1.bf16.msra.mxu0 %v926_v6  ;;  %903 = vmatpush1.bf16.msra.mxu1 %v926_v6  ;;  %v957_v32 = vld [vmem:[#allocation2 + $0x78] sm:$0xff]   ;;  %v1137_v38 = vrot.slane %v95_v36, %v103_v35  ;;  %v1139_v39 = vrot.slane %v95_v36, %v99_v37  ;;  %s685_s17 = sshll.u32 %s1061_s2, 4  ;;  %s686_s17 = int_to_ptr.vmem [resolvable:$true] %s685_s17 }
  0x34   :  { %289 = vmatprep.subr.bf16.mxu0 %v927_v7  ;;  %896 = vmatprep.subr.bf16.mxu1 %v927_v7  ;;  %s1002_s20 = scalar_lea.vmem %s686_s17, 4096  ;;  %p1007_p3 = scmp.lt.s32.totalorder %s686_s17, %s686_s17 }
  0x35   :  { %p1003_p2 = scmp.ne.s32.totalorder %s686_s17, %s1002_s20  ;;  %p1008_p4 = scmp.lt.s32.totalorder %s1002_s20, %s1002_s20 }
  0x37   :  { %290 = vmatpush1.bf16.msra.mxu0 %v929_v8  ;;  %904 = vmatpush1.bf16.msra.mxu1 %v929_v8  ;;  %p1009_p5 = por %p1008_p4, %p1007_p3 }
  0x38   :  { %291 = vmatprep.subr.bf16.mxu0 %v930_v9  ;;  %897 = vmatprep.subr.bf16.mxu1 %v930_v9 }
  0x39   :  { %p1010_p6 = pnand %p1009_p5, %p1003_p2 }
  0x3b   :  { %292 = vmatpush1.bf16.msra.mxu0 %v932_v10  ;;  %905 = vmatpush1.bf16.msra.mxu1 %v932_v10 }
  0x3c   :  { %293 = vmatprep.subr.bf16.mxu0 %v933_v11  ;;  %898 = vmatprep.subr.bf16.mxu1 %v933_v11 }
  0x3f   :  { %294 = vmatpush1.bf16.msra.mxu0 %v935_v12  ;;  %906 = vmatpush1.bf16.msra.mxu1 %v935_v12 }
  0x40   :  { %295 = vmatprep.subr.bf16.mxu0 %v936_v13  ;;  %899 = vmatprep.subr.bf16.mxu1 %v936_v13 }
  0x43   :  { %296 = vmatpush1.bf16.msra.mxu0 %v938_v14  ;;  %907 = vmatpush1.bf16.msra.mxu1 %v938_v14 }
  0x44   :  { %297 = vmatprep.subr.bf16.mxu0 %v939_v15  ;;  %900 = vmatprep.subr.bf16.mxu1 %v939_v15 }
  0x47   :  { %298 = vmatpush1.bf16.msra.mxu0 %v941_v16  ;;  %908 = vmatpush1.bf16.msra.mxu1 %v941_v16 }
  0x4a   :  { %316 = vmatmul.mubr.bf16.vlgmr.msra.gmra.mrb[0].mxu0 %v942_v17  ;;  %396 = vmatmul.mubr.bf16.vlgmr.msra.gmra.mrb[0].mxu1 %v943_v18 }
  0x4b   :  { %325 = vmatprep.mubr.bf16.mxu0 %v1060_v0  ;;  %405 = vmatprep.mubr.bf16.mxu1 %v1060_v0 }
  0x52   :  { %326 = vmatmul.mubr.bf16.gmra.mrb[4].mxu0 %v944_v19  ;;  %406 = vmatmul.mubr.bf16.gmra.mrb[4].mxu1 %v945_v20 }
  0x53   :  { %335 = vmatprep.mubr.bf16.mxu0 %v1060_v0  ;;  %415 = vmatprep.mubr.bf16.mxu1 %v1060_v0 }
  0x5a   :  { %336 = vmatmul.mubr.bf16.gmra.mrb[8].mxu0 %v946_v21  ;;  %416 = vmatmul.mubr.bf16.gmra.mrb[8].mxu1 %v947_v22 }
  0x5b   :  { %345 = vmatprep.mubr.bf16.mxu0 %v1060_v0  ;;  %425 = vmatprep.mubr.bf16.mxu1 %v1060_v0 }
  0x62   :  { %346 = vmatmul.mubr.bf16.gmra.mrb[12].mxu0 %v948_v23  ;;  %426 = vmatmul.mubr.bf16.gmra.mrb[12].mxu1 %v949_v24 }
  0x63   :  { %355 = vmatprep.mubr.bf16.mxu0 %v1060_v0  ;;  %435 = vmatprep.mubr.bf16.mxu1 %v1060_v0 }
  0x6a   :  { %356 = vmatmul.mubr.bf16.gmra.mrb[16].mxu0 %v950_v25  ;;  %436 = vmatmul.mubr.bf16.gmra.mrb[16].mxu1 %v951_v26 }
  0x6b   :  { %365 = vmatprep.mubr.bf16.mxu0 %v1060_v0  ;;  %445 = vmatprep.mubr.bf16.mxu1 %v1060_v0 }
  0x72   :  { %366 = vmatmul.mubr.bf16.gmra.mrb[20].mxu0 %v952_v27  ;;  %446 = vmatmul.mubr.bf16.gmra.mrb[20].mxu1 %v953_v28 }
  0x73   :  { %375 = vmatprep.mubr.bf16.mxu0 %v1060_v0  ;;  %455 = vmatprep.mubr.bf16.mxu1 %v1060_v0 }
  0x7a   :  { %376 = vmatmul.mubr.bf16.gmra.mrb[24].mxu0 %v954_v29  ;;  %456 = vmatmul.mubr.bf16.gmra.mrb[24].mxu1 %v955_v30 }
  0x7b   :  { %385 = vmatprep.mubr.bf16.mxu0 %v1060_v0  ;;  %465 = vmatprep.mubr.bf16.mxu1 %v1060_v0 }
  0x82   :  { %386 = vmatmul.mubr.bf16.gmra.mrb[28].mxu0 %v956_v31  ;;  %466 = vmatmul.mubr.bf16.gmra.mrb[28].mxu1 %v957_v32 }
 0x11d   :  { %v317_v40 = vpop.f32.mrb[0].mxu0  ;;  %v397_v41 = vpop.f32.mrb[0].mxu1 }
 0x11e   :  { %v319_v42 = vpop.f32.mrb[1].mxu0  ;;  %v399_v43 = vpop.f32.mrb[1].mxu1  ;;  %v318_v48 = vadd.f32 %v317_v40, %v1139_v39  ;;  %v398_v49 = vadd.f32 %v397_v41, %v1139_v39 }
 0x11f   :  { %v320_v44 = vadd.f32 %v319_v42, %v1137_v38  ;;  %v400_v45 = vadd.f32 %v399_v43, %v1137_v38  ;;  %v321_v46 = vpop.f32.mrb[2].mxu0  ;;  %v401_v47 = vpop.f32.mrb[2].mxu1 }
 0x120   :  { %v322_v50 = vadd.f32 %v321_v46, %v1139_v39  ;;  %v402_v51 = vadd.f32 %v401_v47, %v1139_v39  ;;  %v323_v52 = vpop.f32.mrb[3].mxu0  ;;  %v403_v53 = vpop.f32.mrb[3].mxu1 }
 0x121   :  { %636 = vst [vmem:[#allocation8] sm:$0xff] %v320_v44  ;;  %652 = vst [vmem:[#allocation8 + $0x80] sm:$0xff] %v400_v45  ;;  %v324_v54 = vadd.f32 %v323_v52, %v1137_v38  ;;  %v404_v55 = vadd.f32 %v403_v53, %v1137_v38 }
 0x122   :  { %v801_v56 = vpack.c.bf16 %v322_v50, %v318_v48  ;;  %v841_v57 = vpack.c.bf16 %v402_v51, %v398_v49 }
 0x123   :  { %637 = vst [vmem:[#allocation8 + $0x8] sm:$0xff] %v324_v54  ;;  %653 = vst [vmem:[#allocation8 + $0x88] sm:$0xff] %v404_v55 }
 0x124   :  { %802 = vst [vmem:[#allocation7] sm:$0xff] %v801_v56   ;;  %885 = vst [vmem:[#allocation7 + $0x40] sm:$0xff] %v841_v57  }
 0x125   :  { %v327_v58 = vpop.f32.mrb[4].mxu0  ;;  %v407_v59 = vpop.f32.mrb[4].mxu1 }
 0x126   :  { %v329_v60 = vpop.f32.mrb[5].mxu0  ;;  %v409_v61 = vpop.f32.mrb[5].mxu1  ;;  %v328_v2 = vadd.f32 %v327_v58, %v1139_v39  ;;  %v408_v3 = vadd.f32 %v407_v59, %v1139_v39 }
 0x127   :  { %v330_v62 = vadd.f32 %v329_v60, %v1137_v38  ;;  %v410_v63 = vadd.f32 %v409_v61, %v1137_v38  ;;  %v331_v0 = vpop.f32.mrb[6].mxu0  ;;  %v411_v1 = vpop.f32.mrb[6].mxu1 }
 0x128   :  { %v332_v4 = vadd.f32 %v331_v0, %v1139_v39  ;;  %v412_v5 = vadd.f32 %v411_v1, %v1139_v39  ;;  %v333_v6 = vpop.f32.mrb[7].mxu0  ;;  %v413_v7 = vpop.f32.mrb[7].mxu1 }
 0x129   :  { %638 = vst [vmem:[#allocation8 + $0x10] sm:$0xff] %v330_v62  ;;  %654 = vst [vmem:[#allocation8 + $0x90] sm:$0xff] %v410_v63  ;;  %v334_v8 = vadd.f32 %v333_v6, %v1137_v38  ;;  %v414_v9 = vadd.f32 %v413_v7, %v1137_v38 }
 0x12a   :  { %v806_v10 = vpack.c.bf16 %v332_v4, %v328_v2  ;;  %v846_v11 = vpack.c.bf16 %v412_v5, %v408_v3 }
 0x12b   :  { %639 = vst [vmem:[#allocation8 + $0x18] sm:$0xff] %v334_v8  ;;  %655 = vst [vmem:[#allocation8 + $0x98] sm:$0xff] %v414_v9 }
 0x12c   :  { %878 = vst [vmem:[#allocation7 + $0x8] sm:$0xff] %v806_v10   ;;  %886 = vst [vmem:[#allocation7 + $0x48] sm:$0xff] %v846_v11  }
 0x12d   :  { %v337_v12 = vpop.f32.mrb[8].mxu0  ;;  %v417_v13 = vpop.f32.mrb[8].mxu1 }
 0x12e   :  { %v339_v14 = vpop.f32.mrb[9].mxu0  ;;  %v419_v15 = vpop.f32.mrb[9].mxu1  ;;  %v338_v20 = vadd.f32 %v337_v12, %v1139_v39  ;;  %v418_v21 = vadd.f32 %v417_v13, %v1139_v39 }
 0x12f   :  { %v340_v16 = vadd.f32 %v339_v14, %v1137_v38  ;;  %v420_v17 = vadd.f32 %v419_v15, %v1137_v38  ;;  %v341_v18 = vpop.f32.mrb[10].mxu0  ;;  %v421_v19 = vpop.f32.mrb[10].mxu1 }
 0x130   :  { %v342_v22 = vadd.f32 %v341_v18, %v1139_v39  ;;  %v422_v23 = vadd.f32 %v421_v19, %v1139_v39  ;;  %v343_v24 = vpop.f32.mrb[11].mxu0  ;;  %v423_v25 = vpop.f32.mrb[11].mxu1 }
 0x131   :  { %640 = vst [vmem:[#allocation8 + $0x20] sm:$0xff] %v340_v16  ;;  %656 = vst [vmem:[#allocation8 + $0xa0] sm:$0xff] %v420_v17  ;;  %v344_v26 = vadd.f32 %v343_v24, %v1137_v38  ;;  %v424_v27 = vadd.f32 %v423_v25, %v1137_v38 }
 0x132   :  { %v811_v28 = vpack.c.bf16 %v342_v22, %v338_v20  ;;  %v851_v29 = vpack.c.bf16 %v422_v23, %v418_v21 }
 0x133   :  { %641 = vst [vmem:[#allocation8 + $0x28] sm:$0xff] %v344_v26  ;;  %657 = vst [vmem:[#allocation8 + $0xa8] sm:$0xff] %v424_v27 }
 0x134   :  { %879 = vst [vmem:[#allocation7 + $0x10] sm:$0xff] %v811_v28   ;;  %887 = vst [vmem:[#allocation7 + $0x50] sm:$0xff] %v851_v29  }
 0x135   :  { %v347_v30 = vpop.f32.mrb[12].mxu0  ;;  %v427_v31 = vpop.f32.mrb[12].mxu1 }
 0x136   :  { %v349_v32 = vpop.f32.mrb[13].mxu0  ;;  %v429_v33 = vpop.f32.mrb[13].mxu1  ;;  %v348_v40 = vadd.f32 %v347_v30, %v1139_v39  ;;  %v428_v41 = vadd.f32 %v427_v31, %v1139_v39 }
 0x137   :  { %v350_v34 = vadd.f32 %v349_v32, %v1137_v38  ;;  %v430_v35 = vadd.f32 %v429_v33, %v1137_v38  ;;  %v351_v36 = vpop.f32.mrb[14].mxu0  ;;  %v431_v37 = vpop.f32.mrb[14].mxu1 }
 0x138   :  { %v352_v42 = vadd.f32 %v351_v36, %v1139_v39  ;;  %v432_v43 = vadd.f32 %v431_v37, %v1139_v39  ;;  %v353_v44 = vpop.f32.mrb[15].mxu0  ;;  %v433_v45 = vpop.f32.mrb[15].mxu1 }
 0x139   :  { %642 = vst [vmem:[#allocation8 + $0x30] sm:$0xff] %v350_v34  ;;  %658 = vst [vmem:[#allocation8 + $0xb0] sm:$0xff] %v430_v35  ;;  %v354_v46 = vadd.f32 %v353_v44, %v1137_v38  ;;  %v434_v47 = vadd.f32 %v433_v45, %v1137_v38 }
 0x13a   :  { %v816_v48 = vpack.c.bf16 %v352_v42, %v348_v40  ;;  %v856_v49 = vpack.c.bf16 %v432_v43, %v428_v41 }
 0x13b   :  { %643 = vst [vmem:[#allocation8 + $0x38] sm:$0xff] %v354_v46  ;;  %659 = vst [vmem:[#allocation8 + $0xb8] sm:$0xff] %v434_v47 }
 0x13c   :  { %880 = vst [vmem:[#allocation7 + $0x18] sm:$0xff] %v816_v48   ;;  %888 = vst [vmem:[#allocation7 + $0x58] sm:$0xff] %v856_v49  }
 0x13d   :  { %v357_v50 = vpop.f32.mrb[16].mxu0  ;;  %v437_v51 = vpop.f32.mrb[16].mxu1 }
 0x13e   :  { %v359_v52 = vpop.f32.mrb[17].mxu0  ;;  %v439_v53 = vpop.f32.mrb[17].mxu1  ;;  %v358_v58 = vadd.f32 %v357_v50, %v1139_v39  ;;  %v438_v59 = vadd.f32 %v437_v51, %v1139_v39 }
 0x13f   :  { %v360_v54 = vadd.f32 %v359_v52, %v1137_v38  ;;  %v440_v55 = vadd.f32 %v439_v53, %v1137_v38  ;;  %v361_v56 = vpop.f32.mrb[18].mxu0  ;;  %v441_v57 = vpop.f32.mrb[18].mxu1 }
 0x140   :  { %v362_v60 = vadd.f32 %v361_v56, %v1139_v39  ;;  %v442_v61 = vadd.f32 %v441_v57, %v1139_v39  ;;  %v363_v62 = vpop.f32.mrb[19].mxu0  ;;  %v443_v63 = vpop.f32.mrb[19].mxu1 }
 0x141   :  { %644 = vst [vmem:[#allocation8 + $0x40] sm:$0xff] %v360_v54  ;;  %660 = vst [vmem:[#allocation8 + $0xc0] sm:$0xff] %v440_v55  ;;  %v364_v0 = vadd.f32 %v363_v62, %v1137_v38  ;;  %v444_v1 = vadd.f32 %v443_v63, %v1137_v38 }
 0x142   :  { %v821_v2 = vpack.c.bf16 %v362_v60, %v358_v58  ;;  %v861_v3 = vpack.c.bf16 %v442_v61, %v438_v59 }
 0x143   :  { %645 = vst [vmem:[#allocation8 + $0x48] sm:$0xff] %v364_v0  ;;  %661 = vst [vmem:[#allocation8 + $0xc8] sm:$0xff] %v444_v1 }
 0x144   :  { %881 = vst [vmem:[#allocation7 + $0x20] sm:$0xff] %v821_v2   ;;  %889 = vst [vmem:[#allocation7 + $0x60] sm:$0xff] %v861_v3  }
 0x145   :  { %v367_v4 = vpop.f32.mrb[20].mxu0  ;;  %v447_v5 = vpop.f32.mrb[20].mxu1 }
 0x146   :  { %v369_v6 = vpop.f32.mrb[21].mxu0  ;;  %v449_v7 = vpop.f32.mrb[21].mxu1  ;;  %v368_v12 = vadd.f32 %v367_v4, %v1139_v39  ;;  %v448_v13 = vadd.f32 %v447_v5, %v1139_v39 }
 0x147   :  { %v370_v8 = vadd.f32 %v369_v6, %v1137_v38  ;;  %v450_v9 = vadd.f32 %v449_v7, %v1137_v38  ;;  %v371_v10 = vpop.f32.mrb[22].mxu0  ;;  %v451_v11 = vpop.f32.mrb[22].mxu1 }
 0x148   :  { %v372_v14 = vadd.f32 %v371_v10, %v1139_v39  ;;  %v452_v15 = vadd.f32 %v451_v11, %v1139_v39  ;;  %v373_v16 = vpop.f32.mrb[23].mxu0  ;;  %v453_v17 = vpop.f32.mrb[23].mxu1 }
 0x149   :  { %646 = vst [vmem:[#allocation8 + $0x50] sm:$0xff] %v370_v8  ;;  %662 = vst [vmem:[#allocation8 + $0xd0] sm:$0xff] %v450_v9  ;;  %v374_v18 = vadd.f32 %v373_v16, %v1137_v38  ;;  %v454_v19 = vadd.f32 %v453_v17, %v1137_v38 }
 0x14a   :  { %v826_v20 = vpack.c.bf16 %v372_v14, %v368_v12  ;;  %v866_v21 = vpack.c.bf16 %v452_v15, %v448_v13 }
 0x14b   :  { %647 = vst [vmem:[#allocation8 + $0x58] sm:$0xff] %v374_v18  ;;  %663 = vst [vmem:[#allocation8 + $0xd8] sm:$0xff] %v454_v19 }
 0x14c   :  { %882 = vst [vmem:[#allocation7 + $0x28] sm:$0xff] %v826_v20   ;;  %890 = vst [vmem:[#allocation7 + $0x68] sm:$0xff] %v866_v21  }
 0x14d   :  { %v377_v22 = vpop.f32.mrb[24].mxu0  ;;  %v457_v23 = vpop.f32.mrb[24].mxu1 }
 0x14e   :  { %v379_v24 = vpop.f32.mrb[25].mxu0  ;;  %v459_v25 = vpop.f32.mrb[25].mxu1  ;;  %v378_v30 = vadd.f32 %v377_v22, %v1139_v39  ;;  %v458_v31 = vadd.f32 %v457_v23, %v1139_v39 }
 0x14f   :  { %v380_v26 = vadd.f32 %v379_v24, %v1137_v38  ;;  %v460_v27 = vadd.f32 %v459_v25, %v1137_v38  ;;  %v381_v28 = vpop.f32.mrb[26].mxu0  ;;  %v461_v29 = vpop.f32.mrb[26].mxu1 }
 0x150   :  { %v382_v32 = vadd.f32 %v381_v28, %v1139_v39  ;;  %v462_v33 = vadd.f32 %v461_v29, %v1139_v39  ;;  %v383_v34 = vpop.f32.mrb[27].mxu0  ;;  %v463_v35 = vpop.f32.mrb[27].mxu1 }
 0x151   :  { %648 = vst [vmem:[#allocation8 + $0x60] sm:$0xff] %v380_v26  ;;  %664 = vst [vmem:[#allocation8 + $0xe0] sm:$0xff] %v460_v27  ;;  %v384_v36 = vadd.f32 %v383_v34, %v1137_v38  ;;  %v464_v37 = vadd.f32 %v463_v35, %v1137_v38 }
 0x152   :  { %v831_v40 = vpack.c.bf16 %v382_v32, %v378_v30  ;;  %v871_v41 = vpack.c.bf16 %v462_v33, %v458_v31 }
 0x153   :  { %649 = vst [vmem:[#allocation8 + $0x68] sm:$0xff] %v384_v36  ;;  %665 = vst [vmem:[#allocation8 + $0xe8] sm:$0xff] %v464_v37 }
 0x154   :  { %883 = vst [vmem:[#allocation7 + $0x30] sm:$0xff] %v831_v40   ;;  %891 = vst [vmem:[#allocation7 + $0x70] sm:$0xff] %v871_v41  }
 0x155   :  { %v387_v42 = vpop.f32.mrb[28].mxu0  ;;  %v467_v43 = vpop.f32.mrb[28].mxu1 }
 0x156   :  { %v389_v44 = vpop.f32.mrb[29].mxu0  ;;  %v469_v45 = vpop.f32.mrb[29].mxu1  ;;  %v388_v50 = vadd.f32 %v387_v42, %v1139_v39  ;;  %v468_v51 = vadd.f32 %v467_v43, %v1139_v39 }
 0x157   :  { %v390_v46 = vadd.f32 %v389_v44, %v1137_v38  ;;  %v470_v47 = vadd.f32 %v469_v45, %v1137_v38  ;;  %v391_v48 = vpop.f32.mrb[30].mxu0  ;;  %v471_v49 = vpop.f32.mrb[30].mxu1 }
 0x158   :  { %v392_v52 = vadd.f32 %v391_v48, %v1139_v39  ;;  %v472_v53 = vadd.f32 %v471_v49, %v1139_v39  ;;  %v393_v54 = vpop.f32.mrb[31].mxu0  ;;  %v473_v55 = vpop.f32.mrb[31].mxu1 }
 0x159   :  { %650 = vst [vmem:[#allocation8 + $0x70] sm:$0xff] %v390_v46  ;;  %666 = vst [vmem:[#allocation8 + $0xf0] sm:$0xff] %v470_v47  ;;  %v394_v56 = vadd.f32 %v393_v54, %v1137_v38  ;;  %v474_v57 = vadd.f32 %v473_v55, %v1137_v38 }
 0x15a   :  { %v836_v58 = vpack.c.bf16 %v392_v52, %v388_v50  ;;  %v876_v59 = vpack.c.bf16 %v472_v53, %v468_v51 }
 0x15b   :  { %651 = vst [vmem:[#allocation8 + $0x78] sm:$0xff] %v394_v56  ;;  %667 = vst [vmem:[#allocation8 + $0xf8] sm:$0xff] %v474_v57 }
 0x15c   :  { %884 = vst [vmem:[#allocation7 + $0x38] sm:$0xff] %v836_v58   ;;  %892 = vst [vmem:[#allocation7 + $0x78] sm:$0xff] %v876_v59  }
 0x15d   :  { %1013 = shalt.err (!%p1010_p6)
}
 0x15e   :  { %s1014_s23 = scalar_lea.hbm %s1246_s4, 4096 }
 0x15f   :  { %p1015_p7 = scmp.ne.s32.totalorder %s1246_s4, %s1014_s23  ;;  %p1018_p8 = scmp.lt.u32.totalorder %s1014_s23, %s1246_s4 }
 0x161   :  { %p1020_p9 = pnand %p1018_p8, %p1015_p7 }
 0x163   :  { %1023 = shalt.err (!%p1020_p9)
}
 0x164   :  { %691 = dma.vmem_to_hbm [thread:$0]  %s686_s17, 4096, %s1246_s4, [#allocation9], %s1058_s0, %s1058_s0, %s1059_s13  }
 0x165   :  { %s1024_s6 = scalar_lea.vmem %s1205_s19, 2048  ;;  %p1029_p11 = scmp.lt.s32.totalorder %s1205_s19, %s1205_s19 }
 0x166   :  { %p1025_p10 = scmp.ne.s32.totalorder %s1205_s19, %s1024_s6  ;;  %p1030_p12 = scmp.lt.s32.totalorder %s1024_s6, %s1024_s6 }
 0x168   :  { %p1031_p13 = por %p1030_p12, %p1029_p11 }
 0x16a   :  { %p1032_p0 = pnand %p1031_p13, %p1025_p10 }
 0x16c   :  { %1035 = shalt.err (!%p1032_p0)
}
 0x16d   :  { %s1036_s9 = scalar_lea.hbm %s1245_s3, 2048 }
 0x16e   :  { %p1037_p1 = scmp.ne.s32.totalorder %s1245_s3, %s1036_s9  ;;  %p1040_p2 = scmp.lt.u32.totalorder %s1036_s9, %s1245_s3 }
 0x170   :  { %p1042_p3 = pnand %p1040_p2, %p1037_p1 }
 0x172   :  { %1045 = shalt.err (!%p1042_p3)
}
 0x173   :  { %679 = dma.vmem_to_hbm [thread:$0]  %s1205_s19, 2048, %s1245_s3, [#allocation4], %s1055_s25, %s1055_s25, %s1056_s26  }
 0x174   :  { %1050 = dma.done.wait [#allocation4], 2048  }
 0x175   :  { %1051 = vsyncadd [#allocation4], 4294965248 }
 0x176   :  { %1052 = dma.done.wait [#allocation9], 4096  }
 0x177   :  { %1053 = vsyncadd [#allocation9], 4294963200 }
 0x178   :  { %698 = vsyncpa [#allocation3], 1 }
 0x179   :  { %699 = vsyncpa [#allocation6], 1 }
 0x17a   :  { %700 = vsyncpa [#allocation4], 1 }
 0x17b   :  { %701 = vsyncpa [#allocation9], 1 }

</bundles_post_ra>
